<compile_context>
chip_gen: v6e
topology: v6e:2x2x1
jax: 0.10.0
libtpu: 0.0.40
codegen_flags: <defaults>
</compile_context>

<pallas_src>
import functools

import jax
import jax.numpy as jnp
from jax.experimental import pallas as pl
from jax.experimental.pallas import tpu as pltpu


_LANES = 128          # lane width of a vreg
_TILE_ROWS = 1024     # (1024, 128) f32 tile = 512 KiB -> ~2 MiB with 2x-buffered
                      # in+out, comfortably under v5e's 16 MiB scoped default.


def _sublane_multiple(dtype) -> int:
    """Native sublane tiling multiple: 8 for f32, 16 for bf16, 32 for int8/fp8."""
    return max(8, 32 // jnp.dtype(dtype).itemsize)


def _make_neg_scale_kernel(neg_alpha: float):
    def kernel(g_ref, o_ref):
        # Single VPU multiply per element; neg_alpha is a compile-time constant
        # (weakly typed, so the grad dtype is preserved — same as torch).
        o_ref[...] = g_ref[...] * neg_alpha
    return kernel


def _neg_scale_slab(slab, neg_alpha: float):
    """Run (-alpha) * slab on a lane-dense (rows, 128) slab, tiled over rows."""
    rows = slab.shape[0]
    tile_r = min(_TILE_ROWS, rows)          # rows is always a sublane multiple
    grid = (pl.cdiv(rows, tile_r),)
    nbytes = slab.size * jnp.dtype(slab.dtype).itemsize
    return pl.pallas_call(
        _make_neg_scale_kernel(neg_alpha),
        out_shape=jax.ShapeDtypeStruct(slab.shape, slab.dtype),
        grid=grid,
        in_specs=[pl.BlockSpec((tile_r, _LANES), lambda i: (i, 0))],
        out_specs=pl.BlockSpec((tile_r, _LANES), lambda i: (i, 0)),
        # Write the reversed gradient back into the incoming buffer (saves an
        # HBM allocation during backward; XLA copies if the input is live).
        input_output_aliases={0: 0},
        cost_estimate=pl.CostEstimate(
            flops=slab.size, transcendentals=0, bytes_accessed=2 * nbytes),
        compiler_params=pltpu.CompilerParams(
            dimension_semantics=("parallel",)),
    )(slab)


def _reverse_grad(g, neg_alpha: float):
    """Compute neg_alpha * g through the Pallas kernel, any input shape."""
    n = g.size
    sub = _sublane_multiple(g.dtype)
    tile_elems = _LANES * sub
    if n % tile_elems == 0:
        # Common case (conv feature maps): zero-copy reshape to a lane-dense
        # slab whose row count is already a native sublane multiple.
        slab = g.reshape(n // _LANES, _LANES)
        return _neg_scale_slab(slab, neg_alpha).reshape(g.shape)

    # Ragged fallback: pad once to alignment, run, slice back.
    # TODO(synk): handle the ragged tail with a masked pltpu.store in the last
    # grid tile instead of this pad/slice HBM round-trip.
    pad = (-n) % tile_elems
    flat = jnp.pad(g.reshape(-1), (0, pad))
    slab = flat.reshape((n + pad) // _LANES, _LANES)
    out = _neg_scale_slab(slab, neg_alpha)
    return out.reshape(-1)[:n].reshape(g.shape)


# ------------------------- GRL with custom gradient ------------------------

@functools.partial(jax.custom_vjp, nondiff_argnums=(1,))
def grl(x, alpha=1.0):
    # Forward of GRL is identity: no kernel, no HBM traffic.
    return x


def _grl_fwd(x, alpha):
    return x, None


def _grl_bwd(alpha, _residuals, g):
    # Backward: grad_output.neg() * alpha ; no grad w.r.t. alpha.
    return (_reverse_grad(g, -float(alpha)),)


grl.defvjp(_grl_fwd, _grl_bwd)


class GRL:
    """JAX/Pallas equivalent of the PyTorch GRL module (no parameters)."""

    def __init__(self, alpha=1.0):
        self.alpha = float(alpha)

    def __call__(self, x):
        return grl(x, self.alpha)


# --------------------------------- main -------------------------------------

if __name__ == "__main__":
    key = jax.random.PRNGKey(0)
    # NCHW input, matching what a PyTorch conv feature map would look like.
    x = jax.random.normal(key, (2, 4, 16, 16), dtype=jnp.float32)

    alpha = 1.0
    module = GRL(alpha=alpha)

    # Forward: identity (no kernel on the hot path).
    y = module(x)
    y = jax.block_until_ready(y)
    assert y.shape == x.shape and y.dtype == x.dtype
    assert jnp.allclose(y, x), "GRL forward must be identity"

    # Backward via VJP with a non-trivial upstream gradient exercises the
    # tiled Pallas gradient-reversal kernel.
    upstream = jax.random.normal(jax.random.PRNGKey(1), x.shape, dtype=x.dtype)
    _, vjp_fn = jax.vjp(lambda inp: module(inp), x)
    (dx,) = vjp_fn(upstream)
    dx = jax.block_until_ready(dx)
    assert jnp.allclose(dx, -alpha * upstream, rtol=1e-6, atol=1e-6), \
        "GRL backward must be -alpha * grad"

    # Backward via jax.grad (unit upstream).
    g = jax.grad(lambda inp: jnp.sum(module(inp)))(x)
    g = jax.block_until_ready(g)
    assert jnp.allclose(g, -alpha * jnp.ones_like(x)), \
        "GRL backward must be -alpha * grad"

    print("KERNEL_OK")
</pallas_src>

<mosaic_0001>
module attributes {stable_mosaic.version = 11 : i64} {
  func.func @kernel(%arg0: i32, %arg1: memref<16x128xf32, #tpu.memory_space<vmem>>, %arg2: memref<16x128xf32, #tpu.memory_space<vmem>>) attributes {dimension_semantics = [#tpu.dimension_semantics<parallel>], iteration_bounds = array<i64: 1>, scalar_prefetch = 0 : i64, scratch_operands = 0 : i64, tpu.core_type = #tpu.core_type<tc>, window_params = [{transform_indices = @transform_0, window_bounds = array<i64: 16, 128>}, {transform_indices = @transform_1, window_bounds = array<i64: 16, 128>}]} {
    %c0 = arith.constant 0 : index
    %c0_0 = arith.constant 0 : index
    %0 = vector.load %arg1[%c0, %c0_0] : memref<16x128xf32, #tpu.memory_space<vmem>>, vector<16x128xf32>
    %cst = arith.constant -1.000000e+00 : f32
    %1 = vector.broadcast %cst : f32 to vector<16x128xf32>
    %2 = arith.mulf %0, %1 : vector<16x128xf32>
    %c0_1 = arith.constant 0 : index
    %c0_2 = arith.constant 0 : index
    %3 = vector.load %arg2[%c0_1, %c0_2] : memref<16x128xf32, #tpu.memory_space<vmem>>, vector<16x128xf32>
    tpu.vector_store %arg2[%c0_1, %c0_2], %2 {strides = array<i32>} : memref<16x128xf32, #tpu.memory_space<vmem>>, vector<16x128xf32>,
    return
  }
  func.func @transform_0(%arg0: i32) -> (i32, i32) {
    %c0_i32 = arith.constant 0 : i32
    %c0_i32_0 = arith.constant 0 : i32
    return %arg0, %c0_i32 : i32, i32
  }
  func.func @transform_1(%arg0: i32) -> (i32, i32) {
    %c0_i32 = arith.constant 0 : i32
    %c0_i32_0 = arith.constant 0 : i32
    return %arg0, %c0_i32 : i32, i32
  }
}

</mosaic_0001>

<bundles_post_ra>
// kernel: tpu_custom_call.1
= control target key start
LH: loop header
LB: loop body
LE: loop exit
PB: predicated region body
PF: predicated region fallthrough
CT: control target
= control target key end

     0   :  { %6 = vsyncpa [#allocation3], 0  ;;  %s114_s0 = inlined_call_operand.hbm [shape: f32[16,128], index: 0, kind: input, shape index: {}, may-alias: {0,1}]   ;;  %s115_s1 = inlined_call_operand.hbm [shape: f32[16,128], index: 1, kind: output, shape index: {}, may-alias: {0,1}]  }
   0x1   :  { %7 = vsyncpa [#allocation4], 0  ;;  %s94_s6 = smov [#allocation2]  }
   0x2   :  { %s13_s7 = sshll.u32 %s94_s6, 4  ;;  %s14_s7 = int_to_ptr.vmem [resolvable:$true] %s13_s7 }
   0x3   :  { %s58_s8 = scalar_lea.vmem %s14_s7, 256  ;;  %p63_p1 = scmp.lt.s32.totalorder %s14_s7, %s14_s7 }
   0x4   :  { %p59_p0 = scmp.ne.s32.totalorder %s14_s7, %s58_s8  ;;  %p64_p2 = scmp.lt.s32.totalorder %s58_s8, %s58_s8 }
   0x6   :  { %p65_p3 = por %p64_p2, %p63_p1 }
   0x8   :  { %p66_p4 = pnand %p65_p3, %p59_p0 }
   0xa   :  { %69 = shalt.err (!%p66_p4)
}
   0xb   :  { %s95_s9 = smov 128   ;;  %s96_s10 = smov 8  }
   0xc   :  { %19 = dma.hbm_to_vmem [thread:$0]  %s114_s0, 256, %s14_s7, [#allocation3], %s95_s9, %s95_s9, %s96_s10  }
   0xd   :  { %90 = dma.done.wait [#allocation3], 256  }
   0xe   :  { %91 = vsyncadd [#allocation3], 4294967040  ;;  %s97_s13 = smov [#allocation5]   ;;  %v23_v0 = vld [vmem:[#allocation2] sm:$0xff]  ;;  %v24_v1 = vld [vmem:[#allocation2 + $0x8] sm:$0xff] }
   0xf   :  { %s34_s14 = sshll.u32 %s97_s13, 4  ;;  %v25_v2 = vmul.f32 -1.0, %v23_v0  ;;  %v26_v3 = vmul.f32 -1.0, %v24_v1  ;;  %s35_s14 = int_to_ptr.vmem [resolvable:$true] %s34_s14 }
  0x10   :  { %s70_s15 = scalar_lea.vmem %s35_s14, 256  ;;  %p75_p6 = scmp.lt.s32.totalorder %s35_s14, %s35_s14 }
  0x11   :  { %27 = vst [vmem:[#allocation5] sm:$0xff] %v25_v2  ;;  %28 = vst [vmem:[#allocation5 + $0x8] sm:$0xff] %v26_v3  ;;  %p71_p5 = scmp.ne.s32.totalorder %s35_s14, %s70_s15  ;;  %p76_p7 = scmp.lt.s32.totalorder %s70_s15, %s70_s15 }
  0x13   :  { %p77_p8 = por %p76_p7, %p75_p6 }
  0x15   :  { %p78_p9 = pnand %p77_p8, %p71_p5 }
  0x17   :  { %81 = shalt.err (!%p78_p9)
}
  0x18   :  { %40 = dma.vmem_to_hbm [thread:$0]  %s35_s14, 256, %s115_s1, [#allocation4], %s95_s9, %s95_s9, %s96_s10  }
  0x19   :  { %92 = dma.done.wait [#allocation4], 256  }
  0x1a   :  { %93 = vsyncadd [#allocation4], 4294967040 }
  0x1b   :  { %44 = vsyncpa [#allocation3], 1 }
  0x1c   :  { %45 = vsyncpa [#allocation4], 1 }

</bundles_post_ra>
